<compile_context>
chip_gen: v7x
topology: tpu7x:2x2x1
jax: 0.10.0
libtpu: 0.0.40
codegen_flags: <defaults>
</compile_context>

<pallas_src>
import jax
import jax.numpy as jnp
from jax.experimental import pallas as pl
from jax.experimental.pallas import tpu as pltpu

BN_EPS = 1e-5
LRELU_SLOPE = 0.2

LATENT_DIM = 32
H1, H2, H3, OUT_DIM = 32, 64, 32, 2

# ---- packed-parameter layout: single (176, 128) f32 slab --------------------
# Small per-feature vectors occupy the first rows; weight matrices follow, each
# starting at an 8-aligned sublane row so slices stay tile-friendly.
ROW_B1, ROW_G1, ROW_BE1 = 0, 1, 2
ROW_B2, ROW_G2, ROW_BE2 = 3, 4, 5
ROW_B3, ROW_G3, ROW_BE3 = 6, 7, 8
ROW_B4 = 9
ROW_EMB = 10                      # rows 10..11  : label embedding (2, LATENT_DIM)
ROW_W1 = 16                       # rows 16..47  : (LATENT_DIM, H1)
ROW_W2 = 48                       # rows 48..79  : (H1, H2)
ROW_W3 = 80                       # rows 80..143 : (H2, H3)
ROW_W4 = 144                      # rows 144..175: (H3, OUT_DIM)
PACK_ROWS, PACK_COLS = 176, 128


def generator_kernel(zin_ref, p_ref, out_ref):
    zin = zin_ref[...]                                  # (B, LATENT_DIM + 1)
    z = zin[:, :LATENT_DIM]                             # (B, LATENT_DIM)
    lab = zin[:, LATENT_DIM:LATENT_DIM + 1]             # (B, 1) float in {0., 1.}

    # 2-class embedding lookup as a VPU blend (no MXU round trip).
    emb0 = p_ref[ROW_EMB:ROW_EMB + 1, :LATENT_DIM]      # (1, LATENT_DIM)
    emb1 = p_ref[ROW_EMB + 1:ROW_EMB + 2, :LATENT_DIM]  # (1, LATENT_DIM)
    emb = emb0 + lab * (emb1 - emb0)                    # (B, LATENT_DIM)

    x = emb * z                                         # gen_input = label_emb(labels) * z

    def linear_bn_lrelu(x, w_row, w_in, w_out, b_row, g_row, be_row):
        w = p_ref[w_row:w_row + w_in, :w_out]           # (in, out)
        b = p_ref[b_row:b_row + 1, :w_out]              # (1, out)
        g = p_ref[g_row:g_row + 1, :w_out]
        be = p_ref[be_row:be_row + 1, :w_out]
        h = jnp.dot(x, w, preferred_element_type=jnp.float32) + b
        mean = jnp.mean(h, axis=0, keepdims=True)
        var = jnp.mean((h - mean) ** 2, axis=0, keepdims=True)   # biased var (training BN)
        hn = (h - mean) * jax.lax.rsqrt(var + BN_EPS) * g + be
        return jnp.where(hn > 0, hn, LRELU_SLOPE * hn)

    x = linear_bn_lrelu(x, ROW_W1, LATENT_DIM, H1, ROW_B1, ROW_G1, ROW_BE1)  # (B, 32)
    x = linear_bn_lrelu(x, ROW_W2, H1, H2, ROW_B2, ROW_G2, ROW_BE2)          # (B, 64)
    x = linear_bn_lrelu(x, ROW_W3, H2, H3, ROW_B3, ROW_G3, ROW_BE3)          # (B, 32)

    w4 = p_ref[ROW_W4:ROW_W4 + H3, :OUT_DIM]            # (32, 2)
    b4 = p_ref[ROW_B4:ROW_B4 + 1, :OUT_DIM]             # (1, 2)
    out_ref[...] = jnp.dot(x, w4, preferred_element_type=jnp.float32) + b4


@jax.jit
def generator_forward(z, labels, packed_params):
    """Single grid-less pallas_call; two VMEM inputs total."""
    B = z.shape[0]
    lab_col = (labels.reshape(B, 1) == 1).astype(jnp.float32)
    zin = jnp.concatenate([z.astype(jnp.float32), lab_col], axis=1)   # (B, LATENT_DIM + 1)

    vmem = pl.BlockSpec(memory_space=pltpu.MemorySpace.VMEM)
    return pl.pallas_call(
        generator_kernel,
        out_shape=jax.ShapeDtypeStruct((B, OUT_DIM), jnp.float32),
        in_specs=[vmem, vmem],
        out_specs=vmem,
    )(zin, packed_params)


def init_params(key, latent_dim):
    """Deterministic synthetic parameters mirroring the PyTorch module's shapes."""
    ks = jax.random.split(key, 10)
    dims = [(latent_dim, H1), (H1, H2), (H2, H3), (H3, OUT_DIM)]
    params = {"emb": jax.random.normal(ks[0], (2, latent_dim), jnp.float32)}
    for i, (din, dout) in enumerate(dims, start=1):
        scale = 1.0 / jnp.sqrt(float(din))
        params[f"w{i}"] = scale * jax.random.normal(ks[2 * i - 1], (din, dout), jnp.float32)
        params[f"b{i}"] = scale * jax.random.normal(ks[2 * i], (1, dout), jnp.float32)
        if i < 4:  # BatchNorm affine (PyTorch default init: gamma=1, beta=0)
            params[f"g{i}"] = jnp.ones((1, dout), jnp.float32)
            params[f"be{i}"] = jnp.zeros((1, dout), jnp.float32)
    return params


def pack_params(params):
    """Pack all 15 parameter tensors into one lane-dense (176, 128) f32 slab."""
    p = jnp.zeros((PACK_ROWS, PACK_COLS), jnp.float32)
    p = p.at[ROW_B1, :H1].set(params["b1"][0])
    p = p.at[ROW_G1, :H1].set(params["g1"][0])
    p = p.at[ROW_BE1, :H1].set(params["be1"][0])
    p = p.at[ROW_B2, :H2].set(params["b2"][0])
    p = p.at[ROW_G2, :H2].set(params["g2"][0])
    p = p.at[ROW_BE2, :H2].set(params["be2"][0])
    p = p.at[ROW_B3, :H3].set(params["b3"][0])
    p = p.at[ROW_G3, :H3].set(params["g3"][0])
    p = p.at[ROW_BE3, :H3].set(params["be3"][0])
    p = p.at[ROW_B4, :OUT_DIM].set(params["b4"][0])
    p = p.at[ROW_EMB:ROW_EMB + 2, :LATENT_DIM].set(params["emb"])
    p = p.at[ROW_W1:ROW_W1 + LATENT_DIM, :H1].set(params["w1"])
    p = p.at[ROW_W2:ROW_W2 + H1, :H2].set(params["w2"])
    p = p.at[ROW_W3:ROW_W3 + H2, :H3].set(params["w3"])
    p = p.at[ROW_W4:ROW_W4 + H3, :OUT_DIM].set(params["w4"])
    return p


def generator_reference(z, labels, params):
    """Pure-JAX reference (PyTorch training-mode forward) for correctness check."""
    x = params["emb"][labels] * z
    for i in range(1, 4):
        h = x @ params[f"w{i}"] + params[f"b{i}"]
        mean = jnp.mean(h, axis=0, keepdims=True)
        var = jnp.mean((h - mean) ** 2, axis=0, keepdims=True)
        hn = (h - mean) / jnp.sqrt(var + BN_EPS)
        hn = hn * params[f"g{i}"] + params[f"be{i}"]
        x = jnp.where(hn > 0, hn, LRELU_SLOPE * hn)
    return x @ params["w4"] + params["b4"]


if __name__ == "__main__":
    B = 8

    key = jax.random.PRNGKey(0)
    k_params, k_z, k_lab = jax.random.split(key, 3)

    params = init_params(k_params, LATENT_DIM)
    packed = pack_params(params)
    z = jax.random.normal(k_z, (B, LATENT_DIM), jnp.float32)
    labels = jax.random.randint(k_lab, (B,), 0, 2, jnp.int32)

    out = jax.block_until_ready(generator_forward(z, labels, packed))
    ref = generator_reference(z, labels, params)

    assert out.shape == (B, OUT_DIM)
    assert jnp.allclose(out, ref, atol=1e-4, rtol=1e-4), "mismatch vs reference"

    print("KERNEL_OK")
</pallas_src>

<mosaic_0001>
module attributes {stable_mosaic.version = 11 : i64} {
  func.func @generator_kernel(%arg0: memref<8x33xf32, #tpu.memory_space<vmem>>, %arg1: memref<176x128xf32, #tpu.memory_space<vmem>>, %arg2: memref<8x2xf32, #tpu.memory_space<vmem>>) attributes {dimension_semantics = [], scalar_prefetch = 0 : i64, scratch_operands = 0 : i64, tpu.core_type = #tpu.core_type<tc>} {
    %c0 = arith.constant 0 : index
    %c0_0 = arith.constant 0 : index
    %0 = vector.load %arg0[%c0, %c0_0] : memref<8x33xf32, #tpu.memory_space<vmem>>, vector<8x33xf32>
    %1 = vector.extract_strided_slice %0 {offsets = [0, 0], sizes = [8, 32], strides = [1, 1]} : vector<8x33xf32> to vector<8x32xf32>
    %2 = vector.extract_strided_slice %0 {offsets = [0, 32], sizes = [8, 1], strides = [1, 1]} : vector<8x33xf32> to vector<8x1xf32>
    %c10 = arith.constant 10 : index
    %c0_1 = arith.constant 0 : index
    %3 = vector.load %arg1[%c10, %c0_1] : memref<176x128xf32, #tpu.memory_space<vmem>>, vector<1x32xf32>
    %c11 = arith.constant 11 : index
    %c0_2 = arith.constant 0 : index
    %4 = vector.load %arg1[%c11, %c0_2] : memref<176x128xf32, #tpu.memory_space<vmem>>, vector<1x32xf32>
    %5 = arith.subf %4, %3 : vector<1x32xf32>
    %6 = vector.broadcast %2 : vector<8x1xf32> to vector<8x32xf32>
    %7 = vector.broadcast %5 : vector<1x32xf32> to vector<8x32xf32>
    %8 = arith.mulf %6, %7 : vector<8x32xf32>
    %9 = vector.broadcast %3 : vector<1x32xf32> to vector<8x32xf32>
    %10 = arith.addf %9, %8 : vector<8x32xf32>
    %11 = arith.mulf %10, %1 : vector<8x32xf32>
    %c16 = arith.constant 16 : index
    %c0_3 = arith.constant 0 : index
    %12 = vector.load %arg1[%c16, %c0_3] : memref<176x128xf32, #tpu.memory_space<vmem>>, vector<32x32xf32>
    %c0_4 = arith.constant 0 : index
    %c0_5 = arith.constant 0 : index
    %13 = vector.load %arg1[%c0_4, %c0_5] : memref<176x128xf32, #tpu.memory_space<vmem>>, vector<1x32xf32>
    %c1 = arith.constant 1 : index
    %c0_6 = arith.constant 0 : index
    %14 = vector.load %arg1[%c1, %c0_6] : memref<176x128xf32, #tpu.memory_space<vmem>>, vector<1x32xf32>
    %c2 = arith.constant 2 : index
    %c0_7 = arith.constant 0 : index
    %15 = vector.load %arg1[%c2, %c0_7] : memref<176x128xf32, #tpu.memory_space<vmem>>, vector<1x32xf32>
    %cst = arith.constant dense<0.000000e+00> : vector<8x32xf32>
    %16 = tpu.matmul %11, %12, %cst {dimension_numbers = #tpu.dot_dimension_numbers<[1], [0], [0], [1], [0, 0, 1, 1], [], []>} : vector<8x32xf32>, vector<32x32xf32>, vector<8x32xf32> -> vector<8x32xf32>
    %17 = vector.broadcast %13 : vector<1x32xf32> to vector<8x32xf32>
    %18 = arith.addf %16, %17 : vector<8x32xf32>
    %cst_8 = arith.constant dense<0.000000e+00> : vector<32xf32>
    %19 = vector.multi_reduction <add>, %18, %cst_8 [0] : vector<8x32xf32> to vector<32xf32>
    %20 = vector.shape_cast %19 : vector<32xf32> to vector<1x32xf32>
    %cst_9 = arith.constant 8.000000e+00 : f32
    %21 = vector.broadcast %cst_9 : f32 to vector<1x32xf32>
    %22 = arith.divf %20, %21 : vector<1x32xf32>
    %23 = vector.broadcast %22 : vector<1x32xf32> to vector<8x32xf32>
    %24 = arith.subf %18, %23 : vector<8x32xf32>
    %25 = arith.mulf %24, %24 : vector<8x32xf32>
    %cst_10 = arith.constant dense<0.000000e+00> : vector<32xf32>
    %26 = vector.multi_reduction <add>, %25, %cst_10 [0] : vector<8x32xf32> to vector<32xf32>
    %27 = vector.shape_cast %26 : vector<32xf32> to vector<1x32xf32>
    %cst_11 = arith.constant 8.000000e+00 : f32
    %28 = vector.broadcast %cst_11 : f32 to vector<1x32xf32>
    %29 = arith.divf %27, %28 : vector<1x32xf32>
    %30 = vector.broadcast %22 : vector<1x32xf32> to vector<8x32xf32>
    %31 = arith.subf %18, %30 : vector<8x32xf32>
    %cst_12 = arith.constant 9.99999974E-6 : f32
    %32 = vector.broadcast %cst_12 : f32 to vector<1x32xf32>
    %33 = arith.addf %29, %32 : vector<1x32xf32>
    %34 = math.rsqrt %33 : vector<1x32xf32>
    %35 = vector.broadcast %34 : vector<1x32xf32> to vector<8x32xf32>
    %36 = arith.mulf %31, %35 : vector<8x32xf32>
    %37 = vector.broadcast %14 : vector<1x32xf32> to vector<8x32xf32>
    %38 = arith.mulf %36, %37 : vector<8x32xf32>
    %39 = vector.broadcast %15 : vector<1x32xf32> to vector<8x32xf32>
    %40 = arith.addf %38, %39 : vector<8x32xf32>
    %cst_13 = arith.constant 0.000000e+00 : f32
    %41 = vector.broadcast %cst_13 : f32 to vector<8x32xf32>
    %42 = arith.cmpf ogt, %40, %41 : vector<8x32xf32>
    %cst_14 = arith.constant 2.000000e-01 : f32
    %43 = vector.broadcast %cst_14 : f32 to vector<8x32xf32>
    %44 = arith.mulf %43, %40 : vector<8x32xf32>
    %45 = arith.select %42, %40, %44 : vector<8x32xi1>, vector<8x32xf32>
    %c48 = arith.constant 48 : index
    %c0_15 = arith.constant 0 : index
    %46 = vector.load %arg1[%c48, %c0_15] : memref<176x128xf32, #tpu.memory_space<vmem>>, vector<32x64xf32>
    %c3 = arith.constant 3 : index
    %c0_16 = arith.constant 0 : index
    %47 = vector.load %arg1[%c3, %c0_16] : memref<176x128xf32, #tpu.memory_space<vmem>>, vector<1x64xf32>
    %c4 = arith.constant 4 : index
    %c0_17 = arith.constant 0 : index
    %48 = vector.load %arg1[%c4, %c0_17] : memref<176x128xf32, #tpu.memory_space<vmem>>, vector<1x64xf32>
    %c5 = arith.constant 5 : index
    %c0_18 = arith.constant 0 : index
    %49 = vector.load %arg1[%c5, %c0_18] : memref<176x128xf32, #tpu.memory_space<vmem>>, vector<1x64xf32>
    %cst_19 = arith.constant dense<0.000000e+00> : vector<8x64xf32>
    %50 = tpu.matmul %45, %46, %cst_19 {dimension_numbers = #tpu.dot_dimension_numbers<[1], [0], [0], [1], [0, 0, 1, 1], [], []>} : vector<8x32xf32>, vector<32x64xf32>, vector<8x64xf32> -> vector<8x64xf32>
    %51 = vector.broadcast %47 : vector<1x64xf32> to vector<8x64xf32>
    %52 = arith.addf %50, %51 : vector<8x64xf32>
    %cst_20 = arith.constant dense<0.000000e+00> : vector<64xf32>
    %53 = vector.multi_reduction <add>, %52, %cst_20 [0] : vector<8x64xf32> to vector<64xf32>
    %54 = vector.shape_cast %53 : vector<64xf32> to vector<1x64xf32>
    %cst_21 = arith.constant 8.000000e+00 : f32
    %55 = vector.broadcast %cst_21 : f32 to vector<1x64xf32>
    %56 = arith.divf %54, %55 : vector<1x64xf32>
    %57 = vector.broadcast %56 : vector<1x64xf32> to vector<8x64xf32>
    %58 = arith.subf %52, %57 : vector<8x64xf32>
    %59 = arith.mulf %58, %58 : vector<8x64xf32>
    %cst_22 = arith.constant dense<0.000000e+00> : vector<64xf32>
    %60 = vector.multi_reduction <add>, %59, %cst_22 [0] : vector<8x64xf32> to vector<64xf32>
    %61 = vector.shape_cast %60 : vector<64xf32> to vector<1x64xf32>
    %cst_23 = arith.constant 8.000000e+00 : f32
    %62 = vector.broadcast %cst_23 : f32 to vector<1x64xf32>
    %63 = arith.divf %61, %62 : vector<1x64xf32>
    %64 = vector.broadcast %56 : vector<1x64xf32> to vector<8x64xf32>
    %65 = arith.subf %52, %64 : vector<8x64xf32>
    %cst_24 = arith.constant 9.99999974E-6 : f32
    %66 = vector.broadcast %cst_24 : f32 to vector<1x64xf32>
    %67 = arith.addf %63, %66 : vector<1x64xf32>
    %68 = math.rsqrt %67 : vector<1x64xf32>
    %69 = vector.broadcast %68 : vector<1x64xf32> to vector<8x64xf32>
    %70 = arith.mulf %65, %69 : vector<8x64xf32>
    %71 = vector.broadcast %48 : vector<1x64xf32> to vector<8x64xf32>
    %72 = arith.mulf %70, %71 : vector<8x64xf32>
    %73 = vector.broadcast %49 : vector<1x64xf32> to vector<8x64xf32>
    %74 = arith.addf %72, %73 : vector<8x64xf32>
    %cst_25 = arith.constant 0.000000e+00 : f32
    %75 = vector.broadcast %cst_25 : f32 to vector<8x64xf32>
    %76 = arith.cmpf ogt, %74, %75 : vector<8x64xf32>
    %cst_26 = arith.constant 2.000000e-01 : f32
    %77 = vector.broadcast %cst_26 : f32 to vector<8x64xf32>
    %78 = arith.mulf %77, %74 : vector<8x64xf32>
    %79 = arith.select %76, %74, %78 : vector<8x64xi1>, vector<8x64xf32>
    %c80 = arith.constant 80 : index
    %c0_27 = arith.constant 0 : index
    %80 = vector.load %arg1[%c80, %c0_27] : memref<176x128xf32, #tpu.memory_space<vmem>>, vector<64x32xf32>
    %c6 = arith.constant 6 : index
    %c0_28 = arith.constant 0 : index
    %81 = vector.load %arg1[%c6, %c0_28] : memref<176x128xf32, #tpu.memory_space<vmem>>, vector<1x32xf32>
    %c7 = arith.constant 7 : index
    %c0_29 = arith.constant 0 : index
    %82 = vector.load %arg1[%c7, %c0_29] : memref<176x128xf32, #tpu.memory_space<vmem>>, vector<1x32xf32>
    %c8 = arith.constant 8 : index
    %c0_30 = arith.constant 0 : index
    %83 = vector.load %arg1[%c8, %c0_30] : memref<176x128xf32, #tpu.memory_space<vmem>>, vector<1x32xf32>
    %cst_31 = arith.constant dense<0.000000e+00> : vector<8x32xf32>
    %84 = tpu.matmul %79, %80, %cst_31 {dimension_numbers = #tpu.dot_dimension_numbers<[1], [0], [0], [1], [0, 0, 1, 1], [], []>} : vector<8x64xf32>, vector<64x32xf32>, vector<8x32xf32> -> vector<8x32xf32>
    %85 = vector.broadcast %81 : vector<1x32xf32> to vector<8x32xf32>
    %86 = arith.addf %84, %85 : vector<8x32xf32>
    %cst_32 = arith.constant dense<0.000000e+00> : vector<32xf32>
    %87 = vector.multi_reduction <add>, %86, %cst_32 [0] : vector<8x32xf32> to vector<32xf32>
    %88 = vector.shape_cast %87 : vector<32xf32> to vector<1x32xf32>
    %cst_33 = arith.constant 8.000000e+00 : f32
    %89 = vector.broadcast %cst_33 : f32 to vector<1x32xf32>
    %90 = arith.divf %88, %89 : vector<1x32xf32>
    %91 = vector.broadcast %90 : vector<1x32xf32> to vector<8x32xf32>
    %92 = arith.subf %86, %91 : vector<8x32xf32>
    %93 = arith.mulf %92, %92 : vector<8x32xf32>
    %cst_34 = arith.constant dense<0.000000e+00> : vector<32xf32>
    %94 = vector.multi_reduction <add>, %93, %cst_34 [0] : vector<8x32xf32> to vector<32xf32>
    %95 = vector.shape_cast %94 : vector<32xf32> to vector<1x32xf32>
    %cst_35 = arith.constant 8.000000e+00 : f32
    %96 = vector.broadcast %cst_35 : f32 to vector<1x32xf32>
    %97 = arith.divf %95, %96 : vector<1x32xf32>
    %98 = vector.broadcast %90 : vector<1x32xf32> to vector<8x32xf32>
    %99 = arith.subf %86, %98 : vector<8x32xf32>
    %cst_36 = arith.constant 9.99999974E-6 : f32
    %100 = vector.broadcast %cst_36 : f32 to vector<1x32xf32>
    %101 = arith.addf %97, %100 : vector<1x32xf32>
    %102 = math.rsqrt %101 : vector<1x32xf32>
    %103 = vector.broadcast %102 : vector<1x32xf32> to vector<8x32xf32>
    %104 = arith.mulf %99, %103 : vector<8x32xf32>
    %105 = vector.broadcast %82 : vector<1x32xf32> to vector<8x32xf32>
    %106 = arith.mulf %104, %105 : vector<8x32xf32>
    %107 = vector.broadcast %83 : vector<1x32xf32> to vector<8x32xf32>
    %108 = arith.addf %106, %107 : vector<8x32xf32>
    %cst_37 = arith.constant 0.000000e+00 : f32
    %109 = vector.broadcast %cst_37 : f32 to vector<8x32xf32>
    %110 = arith.cmpf ogt, %108, %109 : vector<8x32xf32>
    %cst_38 = arith.constant 2.000000e-01 : f32
    %111 = vector.broadcast %cst_38 : f32 to vector<8x32xf32>
    %112 = arith.mulf %111, %108 : vector<8x32xf32>
    %113 = arith.select %110, %108, %112 : vector<8x32xi1>, vector<8x32xf32>
    %c144 = arith.constant 144 : index
    %c0_39 = arith.constant 0 : index
    %114 = vector.load %arg1[%c144, %c0_39] : memref<176x128xf32, #tpu.memory_space<vmem>>, vector<32x2xf32>
    %c9 = arith.constant 9 : index
    %c0_40 = arith.constant 0 : index
    %115 = vector.load %arg1[%c9, %c0_40] : memref<176x128xf32, #tpu.memory_space<vmem>>, vector<1x2xf32>
    %cst_41 = arith.constant dense<0.000000e+00> : vector<8x2xf32>
    %116 = tpu.matmul %113, %114, %cst_41 {dimension_numbers = #tpu.dot_dimension_numbers<[1], [0], [0], [1], [0, 0, 1, 1], [], []>} : vector<8x32xf32>, vector<32x2xf32>, vector<8x2xf32> -> vector<8x2xf32>
    %117 = vector.broadcast %115 : vector<1x2xf32> to vector<8x2xf32>
    %118 = arith.addf %116, %117 : vector<8x2xf32>
    %c0_42 = arith.constant 0 : index
    %c0_43 = arith.constant 0 : index
    %119 = vector.load %arg2[%c0_42, %c0_43] : memref<8x2xf32, #tpu.memory_space<vmem>>, vector<8x2xf32>
    tpu.vector_store %arg2[%c0_42, %c0_43], %118 {strides = array<i32>} : memref<8x2xf32, #tpu.memory_space<vmem>>, vector<8x2xf32>,
    return
  }
}

</mosaic_0001>

<bundles_post_ra>
// kernel: generator_forward.1
= control target key start
LH: loop header
LB: loop body
LE: loop exit
PB: predicated region body
PF: predicated region fallthrough
CT: control target
= control target key end

     0   :  { %7 = vsyncpa [#allocation3], 0  ;;  %s653_s9 = smov [#allocation2]   ;;  %s721_s0 = inlined_call_operand.vmem [shape: f32[8,33], index: 0, kind: input, shape index: {}]   ;;  %s722_s1 = inlined_call_operand.hbm [shape: f32[176,128], index: 1, kind: input, shape index: {}]   ;;  %s723_s2 = inlined_call_operand.vmem [shape: f32[8,2], index: 2, kind: output, shape index: {}]  }
   0x1   :  { %s15_s10 = sshll.u32 %s653_s9, 4  ;;  %s629_s13 = scalar_lea.hbm %s722_s1, 2816  ;;  %s16_s10 = int_to_ptr.vmem [resolvable:$true] %s15_s10 }
   0x2   :  { %p630_p0 = scmp.ne.s32.totalorder %s722_s1, %s629_s13  ;;  %p633_p1 = scmp.lt.u32.totalorder %s629_s13, %s722_s1 }
   0x4   :  { %p635_p2 = pnand %p633_p1, %p630_p0 }
   0x6   :  { %638 = shalt.err (!%p635_p2)
}
   0x7   :  { %s639_s18 = scalar_lea.vmem %s16_s10, 2816  ;;  %p644_p4 = scmp.lt.s32.totalorder %s16_s10, %s16_s10 }
   0x8   :  { %p640_p3 = scmp.ne.s32.totalorder %s16_s10, %s639_s18  ;;  %p645_p5 = scmp.lt.s32.totalorder %s639_s18, %s639_s18 }
   0xa   :  { %p646_p6 = por %p645_p5, %p644_p4 }
   0xc   :  { %p647_p7 = pnand %p646_p6, %p640_p3 }
   0xe   :  { %650 = shalt.err (!%p647_p7)
}
   0xf   :  { %s654_s19 = smov 128   ;;  %s655_s20 = smov 8  }
  0x10   :  { %21 = dma.hbm_to_vmem [thread:$0]  %s722_s1, 2816, %s16_s10, [#allocation3], %s654_s19, %s654_s19, %s655_s20  }
  0x11   :  { %651 = dma.done.wait [#allocation3], 2816  }
  0x12   :  { %652 = vsyncadd [#allocation3], 4294964480  ;;  %v656_v0 = vmov 32   ;;  %v657_v1 = vmov 0.0|0.0   ;;  %v25_v2 = vld [vmem:[%s721_s0] sm:$0xff]  ;;  %v45_v3 = vld [vmem:[#allocation2 + $0x10] sm:$0xff]  ;;  %v34_v10 = vlaneseq }
  0x13   :  { %622 = vset.pattern.permute.xlu0 %v656_v0  ;;  %585 = vmatprep.subr.bf16.mxu0 %v657_v1  ;;  %v46_v4 = vld [vmem:[#allocation2 + $0x18] sm:$0xff]  ;;  %v47_v6 = vld [vmem:[#allocation2 + $0x20] sm:$0xff]  ;;  %v48_v7 = vld [vmem:[#allocation2 + $0x28] sm:$0xff]  ;;  %vm658_vm0 = vmmov 0   ;;  %v659_v9 = vmov 0.0   ;;  %vm56_vm1 = vcmask 261120  }
  0x14   :  { %591 = vmatprep.subr.bf16.mxu1 %v657_v1  ;;  %31 = vperm.xlu0 %622, %v25_v2   ;;  %v586_v5 = vpack.c.bf16 %v46_v4, %v45_v3  ;;  %v589_v8 = vpack.c.bf16 %v48_v7, %v47_v6  ;;  %v35_v11 = vshrl.u32 %v34_v10, 7  ;;  %v26_v12 = vld [vmem:[#allocation2 + $0xa] sm:$0x1]  ;;  %v27_v13 = vld [vmem:[#allocation2 + $0xb] sm:$0x1]  ;;  %v165_v22 = vld [vmem:[#allocation2 + $0x30] sm:$0xff] }
  0x15   :  { %541 = vmatprep.mubr.msk.f32.mxu0 %vm658_vm0, %v659_v9  ;;  %552 = vmatprep.mubr.msk.f32.mxu1 %vm658_vm0, %v659_v9  ;;  %v28_v14 = vsub.f32 %v27_v13, %v26_v12  ;;  %v166_v23 = vld [vmem:[#allocation2 + $0x38] sm:$0xff]  ;;  %v167_v25 = vld [vmem:[#allocation2 + $0x40] sm:$0xff]  ;;  %v168_v26 = vld [vmem:[#allocation2 + $0x48] sm:$0xff]  ;;  %vm249_vm3 = vcmask 523264   ;;  %vm488_vm6 = vcmask 15360  }
  0x16   :  { %587 = vmatpush3.bf16.msra.mxu0 %v586_v5  ;;  %v36_v15 = vsub.s32 0, %v35_v11  ;;  %v592_v24 = vpack.c.bf16 %v166_v23, %v165_v22  ;;  %v595_v27 = vpack.c.bf16 %v168_v26, %v167_v25  ;;  %v495_v28 = vld [vmem:[#allocation2] ss:$0 sm:$0xff]  ;;  %v497_v52 = vld [vmem:[#allocation2 + $0x1] ss:$0 sm:$0xff]  ;;  %v284_v59 = vld [vmem:[#allocation2 + $0x50] sm:$0xff] }
  0x17   :  { %588 = vmatprep.subr.bf16.mxu0 %v657_v1  ;;  %v498_v54 = vld [vmem:[#allocation2 + $0x2] ss:$0 sm:$0xff]  ;;  %v285_v60 = vld [vmem:[#allocation2 + $0x58] sm:$0xff]  ;;  %v287_v63 = vld [vmem:[#allocation2 + $0x68] sm:$0xff] }
  0x18   :  { %v37_v16 = vrot.slane %v28_v14, %v36_v15  ;;  %v42_v17 = vrot.slane %v26_v12, %v36_v15  ;;  %593 = vmatpush3.bf16.msra.mxu1 %v592_v24  ;;  %v598_v61 = vpack.c.bf16 %v285_v60, %v284_v59  ;;  %v286_v62 = vld [vmem:[#allocation2 + $0x60] sm:$0xff]  ;;  %v289_v3 = vld [vmem:[#allocation2 + $0x78] sm:$0xff]  ;;  %v291_v6 = vld [vmem:[#allocation2 + $0x88] sm:$0xff] }
  0x19   :  { %594 = vmatprep.subr.bf16.mxu1 %v657_v1  ;;  %v601_v0 = vpack.c.bf16 %v287_v63, %v286_v62  ;;  %v290_v5 = vld [vmem:[#allocation2 + $0x80] sm:$0xff] }
  0x1a   :  { %590 = vmatpush3.bf16.msra.mxu0 %v589_v8  ;;  %v607_v7 = vpack.c.bf16 %v291_v6, %v290_v5  ;;  %v499_v8 = vld [vmem:[#allocation2 + $0x3] ss:$0 sm:$0xff]  ;;  %v505_v5 = vld [vmem:[#allocation2 + $0x7] ss:$0 sm:$0xff] }
  0x1b   :  { %597 = vmatprep.subr.bf16.mxu0 %v657_v1 }
  0x1c   :  { %596 = vmatpush3.bf16.msra.mxu1 %v595_v27 }
  0x1d   :  { %609 = vmatprep.subr.bf16.mxu1 %v657_v1 }
  0x93   :  { %v32_v18 = vpop.permute.xlu0 %31 }
  0x94   :  { %v38_v19 = vmul.f32 %v37_v16, %v32_v18 }
  0x96   :  { %v43_v20 = vadd.f32 %v42_v17, %v38_v19 }
  0x98   :  { %v44_v21 = vmul.f32 %v43_v20, %v25_v2  ;;  %v288_v2 = vld [vmem:[#allocation2 + $0x70] sm:$0xff] }
  0x99   :  { %v604_v4 = vpack.c.bf16 %v289_v3, %v288_v2 }
  0x9a   :  { %542 = vmatmul.mubr.msk.f32.vlgmr.msra.gmra.mrb[0].mxu0 %vm56_vm1, %v44_v21 }
  0x9b   :  { %571 = vmatprep.mubr.msk.f32.mxu0 %vm658_vm0, %v659_v9  ;;  %599 = vmatpush3.bf16.msra.mxu0 %v598_v61 }
  0x9c   :  { %600 = vmatprep.subr.bf16.mxu0 %v657_v1 }
  0x9f   :  { %602 = vmatpush3.bf16.msra.mxu0 %v601_v0 }
  0xa0   :  { %603 = vmatprep.subr.bf16.mxu0 %v657_v1 }
  0xa3   :  { %605 = vmatpush3.bf16.msra.mxu0 %v604_v4 }
  0xa4   :  { %606 = vmatprep.subr.bf16.mxu0 %v657_v1 }
  0xa7   :  { %608 = vmatpush3.bf16.msra.mxu0 %v607_v7  ;;  %v506_v7 = vld [vmem:[#allocation2 + $0x8] ss:$0 sm:$0xff] }
 0x16d   :  { %v126_v29 = vpop.f32.mrb[0].mxu0 }
 0x16e   :  { %v127_v30 = vadd.f32 %v495_v28, %v126_v29  ;;  %v543_v31 = vpop.f32.mrb[1].mxu0 }
 0x170   :  { %v130_v32 = vsel %vm56_vm1, %v127_v30, 0.0 }
 0x171   :  { %v131_v33 = vrot.slane %v130_v32, 4 }
 0x173   :  { %v132_v34 = vadd.f32 %v131_v33, %v130_v32  ;;  %v501_v32 = vld [vmem:[#allocation2 + $0x4] ss:$0 sm:$0xff] }
 0x175   :  { %v133_v35 = vrot.slane %v132_v34, 2 }
 0x177   :  { %v134_v36 = vadd.f32 %v133_v35, %v132_v34  ;;  %v502_v34 = vld [vmem:[#allocation2 + $0x5] ss:$0 sm:$0xff] }
 0x179   :  { %v135_v37 = vrot.slane %v134_v36, 1 }
 0x17b   :  { %v136_v38 = vadd.f32 %v135_v37, %v134_v36 }
 0x17d   :  { %v138_v39 = vmul.f32 0.125, %v136_v38 }
 0x17f   :  { %v139_v40 = vsub.f32 %v127_v30, %v138_v39  ;;  %v406_v39 = vld [vmem:[#allocation2 + $0x90] sm:$0xff] }
 0x181   :  { %v140_v41 = vmul.f32 %v139_v40, %v139_v40 }
 0x183   :  { %v141_v42 = vsel %vm56_vm1, %v140_v41, 0.0 }
 0x184   :  { %v142_v43 = vrot.slane %v141_v42, 4 }
 0x186   :  { %v143_v44 = vadd.f32 %v142_v43, %v141_v42  ;;  %v408_v42 = vld [vmem:[#allocation2 + $0xa0] sm:$0xff]  ;;  %v409_v43 = vld [vmem:[#allocation2 + $0xa8] sm:$0xff] }
 0x188   :  { %v144_v45 = vrot.slane %v143_v44, 2 }
 0x18a   :  { %v145_v46 = vadd.f32 %v144_v45, %v143_v44  ;;  %v613_v44 = vpack.c.bf16 %v409_v43, %v408_v42  ;;  %v503_v45 = vld [vmem:[#allocation2 + $0x6] ss:$0 sm:$0xff] }
 0x18c   :  { %v146_v47 = vrot.slane %v145_v46, 1 }
 0x18e   :  { %v147_v48 = vadd.f32 %v146_v47, %v145_v46 }
 0x190   :  { %v148_v49 = vmul.f32 0.125, %v147_v48 }
 0x192   :  { %v149_v50 = vadd.f32 1e-05, %v148_v49 }
 0x194   :  { %623 = vrsqrt.f32 %v149_v50 }
 0x19e   :  { %v624_v51 = vpop.eup %623 }
 0x19f   :  { %v151_v53 = vmul.f32 %v624_v51, %v139_v40  ;;  %v407_v40 = vld [vmem:[#allocation2 + $0x98] sm:$0xff] }
 0x1a0   :  { %v610_v41 = vpack.c.bf16 %v407_v40, %v406_v39 }
 0x1a1   :  { %v156_v55 = vmul.f32 %v497_v52, %v151_v53 }
 0x1a3   :  { %v161_v56 = vadd.f32 %v498_v54, %v156_v55 }
 0x1a5   :  { %vm162_vm2 = vcmp.gt.f32.partialorder %v161_v56, 0.0  ;;  %v163_v57 = vmul.f32 0.2, %v161_v56 }
 0x1a7   :  { %v164_v58 = vsel %vm162_vm2, %v161_v56, %v163_v57 }
 0x1a8   :  { %553 = vmatmul.mubr.msk.f32.vlgmr.msra.gmra.mrb[0].mxu1 %vm56_vm1, %v164_v58 }
 0x1a9   :  { %582 = vmatprep.mubr.msk.f32.mxu1 %vm658_vm0, %v659_v9  ;;  %611 = vmatpush3.bf16.msra.mxu1 %v610_v41 }
 0x1aa   :  { %612 = vmatprep.subr.bf16.mxu1 %v657_v1 }
 0x1ad   :  { %614 = vmatpush3.bf16.msra.mxu1 %v613_v44 }
 0x27b   :  { %v245_v9 = vpop.f32.mrb[0].mxu1 }
 0x27c   :  { %v246_v10 = vadd.f32 %v499_v8, %v245_v9  ;;  %v554_v11 = vpop.f32.mrb[1].mxu1 }
 0x27e   :  { %v250_v12 = vsel %vm249_vm3, %v246_v10, 0.0 }
 0x27f   :  { %v251_v13 = vrot.slane %v250_v12, 4 }
 0x281   :  { %v252_v14 = vadd.f32 %v251_v13, %v250_v12  ;;  %v507_v12 = vld [vmem:[#allocation2 + $0x9] ss:$0 sm:$0xff] }
 0x283   :  { %v253_v15 = vrot.slane %v252_v14, 2 }
 0x285   :  { %v254_v16 = vadd.f32 %v253_v15, %v252_v14 }
 0x287   :  { %v255_v17 = vrot.slane %v254_v16, 1 }
 0x289   :  { %v256_v18 = vadd.f32 %v255_v17, %v254_v16 }
 0x28b   :  { %v257_v19 = vmul.f32 0.125, %v256_v18 }
 0x28d   :  { %v258_v20 = vsub.f32 %v246_v10, %v257_v19 }
 0x28f   :  { %v259_v21 = vmul.f32 %v258_v20, %v258_v20 }
 0x291   :  { %v260_v22 = vsel %vm249_vm3, %v259_v21, 0.0 }
 0x292   :  { %v261_v23 = vrot.slane %v260_v22, 4 }
 0x294   :  { %v262_v24 = vadd.f32 %v261_v23, %v260_v22 }
 0x296   :  { %v263_v25 = vrot.slane %v262_v24, 2 }
 0x298   :  { %v264_v26 = vadd.f32 %v263_v25, %v262_v24 }
 0x29a   :  { %v265_v27 = vrot.slane %v264_v26, 1 }
 0x29c   :  { %v266_v28 = vadd.f32 %v265_v27, %v264_v26 }
 0x29e   :  { %v267_v29 = vmul.f32 0.125, %v266_v28 }
 0x2a0   :  { %v268_v30 = vadd.f32 1e-05, %v267_v29 }
 0x2a2   :  { %625 = vrsqrt.f32 %v268_v30 }
 0x2ac   :  { %v626_v31 = vpop.eup %625 }
 0x2ad   :  { %v270_v33 = vmul.f32 %v626_v31, %v258_v20 }
 0x2af   :  { %v275_v35 = vmul.f32 %v501_v32, %v270_v33 }
 0x2b1   :  { %v280_v36 = vadd.f32 %v502_v34, %v275_v35 }
 0x2b3   :  { %vm281_vm4 = vcmp.gt.f32.partialorder %v280_v36, 0.0  ;;  %v282_v37 = vmul.f32 0.2, %v280_v36 }
 0x2b5   :  { %v283_v38 = vsel %vm281_vm4, %v280_v36, %v282_v37 }
 0x2b6   :  { %572 = vmatmul.mubr.msk.f32.vlgmr.msra.gmra.mrb[2].mxu0 %vm249_vm3, %v283_v38 }
 0x389   :  { %v368_v46 = vpop.f32.mrb[2].mxu0 }
 0x38a   :  { %v369_v47 = vadd.f32 %v503_v45, %v368_v46  ;;  %v573_v48 = vpop.f32.mrb[3].mxu0 }
 0x38c   :  { %v372_v49 = vsel %vm56_vm1, %v369_v47, 0.0 }
 0x38d   :  { %v373_v50 = vrot.slane %v372_v49, 4 }
 0x38f   :  { %v374_v51 = vadd.f32 %v373_v50, %v372_v49 }
 0x391   :  { %v375_v52 = vrot.slane %v374_v51, 2 }
 0x393   :  { %v376_v53 = vadd.f32 %v375_v52, %v374_v51 }
 0x395   :  { %v377_v54 = vrot.slane %v376_v53, 1 }
 0x397   :  { %v378_v55 = vadd.f32 %v377_v54, %v376_v53 }
 0x399   :  { %v379_v56 = vmul.f32 0.125, %v378_v55 }
 0x39b   :  { %v380_v57 = vsub.f32 %v369_v47, %v379_v56 }
 0x39d   :  { %v381_v58 = vmul.f32 %v380_v57, %v380_v57 }
 0x39f   :  { %v382_v1 = vsel %vm56_vm1, %v381_v58, 0.0 }
 0x3a0   :  { %v383_v59 = vrot.slane %v382_v1, 4 }
 0x3a2   :  { %v384_v60 = vadd.f32 %v383_v59, %v382_v1 }
 0x3a4   :  { %v385_v61 = vrot.slane %v384_v60, 2 }
 0x3a6   :  { %v386_v62 = vadd.f32 %v385_v61, %v384_v60 }
 0x3a8   :  { %v387_v63 = vrot.slane %v386_v62, 1 }
 0x3aa   :  { %v388_v0 = vadd.f32 %v387_v63, %v386_v62 }
 0x3ac   :  { %v389_v2 = vmul.f32 0.125, %v388_v0 }
 0x3ae   :  { %v390_v3 = vadd.f32 1e-05, %v389_v2 }
 0x3b0   :  { %627 = vrsqrt.f32 %v390_v3 }
 0x3ba   :  { %v628_v4 = vpop.eup %627 }
 0x3bb   :  { %v392_v6 = vmul.f32 %v628_v4, %v380_v57 }
 0x3bd   :  { %v397_v8 = vmul.f32 %v505_v5, %v392_v6 }
 0x3bf   :  { %v402_v9 = vadd.f32 %v506_v7, %v397_v8 }
 0x3c1   :  { %vm403_vm5 = vcmp.gt.f32.partialorder %v402_v9, 0.0  ;;  %v404_v10 = vmul.f32 0.2, %v402_v9 }
 0x3c3   :  { %v405_v11 = vsel %vm403_vm5, %v402_v9, %v404_v10 }
 0x3c4   :  { %583 = vmatmul.mubr.msk.f32.vlgmr.msra.gmra.mrb[2].mxu1 %vm56_vm1, %v405_v11 }
 0x497   :  { %v484_v13 = vpop.f32.mrb[2].mxu1 }
 0x498   :  { %v485_v14 = vadd.f32 %v507_v12, %v484_v13  ;;  %v584_v15 = vpop.f32.mrb[3].mxu1 }
 0x49a   :  { %489 = vst.msk [vmem:[%s723_s2] sm:$0xff] %vm488_vm6, %v485_v14 }
 0x49b   :  { %494 = vsyncpa [#allocation3], 1 }

</bundles_post_ra>
